<compile_context>
chip_gen: v7x
topology: tpu7x:2x2x1
jax: 0.10.0
libtpu: 0.0.40
codegen_flags: <defaults>
</compile_context>

<pallas_src>
import functools

import numpy as np

import jax
import jax.numpy as jnp
from jax.experimental import pallas as pl
from jax.experimental.pallas import tpu as pltpu


def _round_up(x, m):
    return ((x + m - 1) // m) * m


def _cdiv(a, b):
    return -(-a // b)


def _choose_batch_tile(B, max_tb=1024):
    """Batch tile: big tiles to amortize per-grid-step overhead, but keep
    >= 2 grid steps for large batches so both v7x TensorCores get work."""
    if B <= 512:
        return _round_up(B, 8)
    return min(max_tb, _round_up(_cdiv(B, 2), 8))


# ----------------------------------------------------------------------------
# Kernel
# ----------------------------------------------------------------------------
def _policy_kernel(x_ref, w0_ref, wh_ref, b_ref, w_head_ref, b_head_ref, out_ref):
    """One batch tile of the 6-layer ReLU MLP + fused [mean | std-logit] head.

    x_ref      : (TB, S_pad)    states, state_dim zero-padded to 8 lanes
    w0_ref     : (S_pad, H)     layer-0 weight (rows past state_dim are zero)
    wh_ref     : (L-1, H, H)    hidden-layer weights (layers 1..5)
    b_ref      : (L, 1, H)      biases for layers 0..5 (f32)
    w_head_ref : (H, OUT_W)     fused head: cols [0:A]=mean, [A:2A]=std-logit
    b_head_ref : (1, OUT_W)     fused head bias (f32)
    out_ref    : (TB, OUT_W)    f32; cols [0:A]=mean, [A:2A]=std logits
    """
    cdt = w0_ref.dtype  # compute dtype fed to the MXU (f32 or bf16)

    z = jnp.dot(x_ref[...], w0_ref[...], preferred_element_type=jnp.float32) + b_ref[0]
    h = jnp.maximum(z, 0.0)

    for i in range(wh_ref.shape[0]):  # static unroll: 5 hidden layers
        z = (jnp.dot(h.astype(cdt), wh_ref[i], preferred_element_type=jnp.float32)
             + b_ref[i + 1])
        h = jnp.maximum(z, 0.0)

    head = (jnp.dot(h.astype(cdt), w_head_ref[...], preferred_element_type=jnp.float32)
            + b_head_ref[...])
    out_ref[...] = head.astype(out_ref.dtype)


# ----------------------------------------------------------------------------
# Wrapper
# ----------------------------------------------------------------------------
@functools.partial(jax.jit, static_argnames=("action_dim",))
def policy_forward(x, packed, *, action_dim):
    """x: (B, state_dim) f32.  Returns (mean, std), each (B, action_dim) f32."""
    B, S = x.shape
    w0, w_hidden = packed["w0"], packed["w_hidden"]
    b_all = packed["b_all"]
    w_head, b_head = packed["w_head"], packed["b_head"]
    S_pad = w0.shape[0]
    OUT_W = w_head.shape[1]

    TB = _choose_batch_tile(B)
    n_tiles = _cdiv(B, TB)
    B_pad = n_tiles * TB

    # Lane-pad states (3 -> 8) and cast to the compute dtype: 16-32 bytes/row
    # instead of the 512-byte (B_pad, 128) f32 slab used previously.
    x_in = jnp.zeros((B_pad, S_pad), w0.dtype).at[:B, :S].set(x.astype(w0.dtype))

    out = pl.pallas_call(
        _policy_kernel,
        out_shape=jax.ShapeDtypeStruct((B_pad, OUT_W), jnp.float32),
        grid_spec=pltpu.PrefetchScalarGridSpec(
            num_scalar_prefetch=0,
            grid=(n_tiles,),
            in_specs=[
                pl.BlockSpec((TB, S_pad), lambda i: (i, 0)),        # states: streamed
                pl.BlockSpec(w0.shape, lambda i: (0, 0)),           # params: resident
                pl.BlockSpec(w_hidden.shape, lambda i: (0, 0, 0)),
                pl.BlockSpec(b_all.shape, lambda i: (0, 0, 0)),
                pl.BlockSpec(w_head.shape, lambda i: (0, 0)),
                pl.BlockSpec(b_head.shape, lambda i: (0, 0)),
            ],
            out_specs=pl.BlockSpec((TB, OUT_W), lambda i: (i, 0)),
        ),
        compiler_params=pltpu.CompilerParams(
            dimension_semantics=("parallel",)),  # batch tiles across v7x's 2 TCs
    )(x_in, w0, w_hidden, b_all, w_head, b_head)

    mean = out[:B, :action_dim]
    std = jnp.exp(out[:B, action_dim:2 * action_dim])  # exp on (B, A), not (TB, 128)
    return mean, std


# ----------------------------------------------------------------------------
# Parameter construction / packing
# ----------------------------------------------------------------------------
def init_policy_params(key, state_dim, action_dim, hidden_size=64):
    """Per-layer params mirroring nn.Linear default init.

    Weights are stored (in_features, out_features) so forward is x @ W + b.
    """
    dims = [(state_dim, hidden_size)] + [(hidden_size, hidden_size)] * 5 + [
        (hidden_size, action_dim),   # mean head
        (hidden_size, action_dim),   # std head
    ]
    params = []
    for fan_in, fan_out in dims:
        key, kw, kb = jax.random.split(key, 3)
        bound = 1.0 / jnp.sqrt(float(fan_in))
        w = jax.random.uniform(kw, (fan_in, fan_out), jnp.float32, -bound, bound)
        b = jax.random.uniform(kb, (1, fan_out), jnp.float32, -bound, bound)
        params.extend([w, b])
    return tuple(params)


def pack_policy_params(params, state_dim, action_dim, hidden_size=64, num_hidden=6,
                       param_dtype=jnp.float32):
    """Pack 16 small tensors into 5 lane/sublane-dense arrays (K = hidden_size)."""
    assert hidden_size % 8 == 0
    S_pad = _round_up(state_dim, 8)
    OUT_W = _round_up(2 * action_dim, 8)
    H, A = hidden_size, action_dim

    ws = [np.asarray(p, np.float32) for p in params[0::2]]
    bs = [np.asarray(p, np.float32) for p in params[1::2]]

    w0 = np.zeros((S_pad, H), np.float32)
    w0[:state_dim, :] = ws[0]
    w_hidden = np.stack(ws[1:num_hidden], axis=0)          # (5, H, H)
    b_all = np.stack(bs[:num_hidden], axis=0)              # (6, 1, H)

    w_head = np.zeros((H, OUT_W), np.float32)
    b_head = np.zeros((1, OUT_W), np.float32)
    w_head[:, :A] = ws[num_hidden]                          # mean head
    w_head[:, A:2 * A] = ws[num_hidden + 1]                 # std-logit head
    b_head[:, :A] = bs[num_hidden]
    b_head[:, A:2 * A] = bs[num_hidden + 1]

    return {
        "w0": jnp.asarray(w0, param_dtype),
        "w_hidden": jnp.asarray(w_hidden, param_dtype),
        "b_all": jnp.asarray(b_all, jnp.float32),          # biases stay f32
        "w_head": jnp.asarray(w_head, param_dtype),
        "b_head": jnp.asarray(b_head, jnp.float32),
    }


# ----------------------------------------------------------------------------
# Pure-JAX reference (uses the original unpacked params)
# ----------------------------------------------------------------------------
def policy_forward_ref(x, params):
    (w1, b1, w2, b2, w3, b3, w4, b4, w5, b5, w6, b6, wm, bm, ws, bs) = params
    h = x
    for w, b in ((w1, b1), (w2, b2), (w3, b3), (w4, b4), (w5, b5), (w6, b6)):
        h = jnp.maximum(h @ w + b, 0.0)
    return h @ wm + bm, jnp.exp(h @ ws + bs)


# TODO(synk): Adam optimizer / backprop() from the PyTorch module is training
# machinery (and gym env wrappers are host-side); forward pass only.

if __name__ == "__main__":
    # Pendulum-v1: state_dim=3, action_dim=1
    state_dim, action_dim, hidden_size = 3, 1, 64

    key = jax.random.PRNGKey(0)
    key, kp = jax.random.split(key)
    params = init_policy_params(kp, state_dim, action_dim, hidden_size)
    packed_f32 = pack_policy_params(params, state_dim, action_dim, hidden_size,
                                    param_dtype=jnp.float32)
    packed_bf16 = pack_policy_params(params, state_dim, action_dim, hidden_size,
                                     param_dtype=jnp.bfloat16)

    # f32 path: exact-dim batch, ragged batch (padded to tile), multi-tile batch.
    for batch in (8, 20, 600):
        key, kx = jax.random.split(key)
        x = jax.random.normal(kx, (batch, state_dim), jnp.float32)

        mean, std = policy_forward(x, packed_f32, action_dim=action_dim)
        jax.block_until_ready((mean, std))

        mean_ref, std_ref = policy_forward_ref(x, params)
        assert mean.shape == (batch, action_dim) and std.shape == (batch, action_dim)
        assert jnp.allclose(mean, mean_ref, atol=1e-4, rtol=1e-4)
        assert jnp.allclose(std, std_ref, atol=1e-4, rtol=1e-4)
        assert bool(jnp.all(std > 0.0))

    # bf16 fast path (v6e/v7x MXU): looser tolerance, f32 accumulation/outputs.
    key, kx = jax.random.split(key)
    x = jax.random.normal(kx, (600, state_dim), jnp.float32)
    mean_b, std_b = policy_forward(x, packed_bf16, action_dim=action_dim)
    jax.block_until_ready((mean_b, std_b))
    mean_ref, std_ref = policy_forward_ref(x, params)
    assert jnp.allclose(mean_b, mean_ref, atol=2e-2, rtol=2e-2)
    assert jnp.allclose(std_b, std_ref, atol=2e-2, rtol=2e-2)
    assert bool(jnp.all(std_b > 0.0))

    print("KERNEL_OK")
</pallas_src>

<mosaic_0001>
module attributes {stable_mosaic.version = 11 : i64} {
  func.func @_policy_kernel(%arg0: i32, %arg1: memref<8x8xf32, #tpu.memory_space<vmem>>, %arg2: memref<8x64xf32, #tpu.memory_space<vmem>>, %arg3: memref<5x64x64xf32, #tpu.memory_space<vmem>>, %arg4: memref<6x1x64xf32, #tpu.memory_space<vmem>>, %arg5: memref<64x8xf32, #tpu.memory_space<vmem>>, %arg6: memref<1x8xf32, #tpu.memory_space<vmem>>, %arg7: memref<8x8xf32, #tpu.memory_space<vmem>>) attributes {dimension_semantics = [#tpu.dimension_semantics<parallel>], iteration_bounds = array<i64: 1>, scalar_prefetch = 0 : i64, scratch_operands = 0 : i64, tpu.core_type = #tpu.core_type<tc>, window_params = [{transform_indices = @transform_0, window_bounds = array<i64: 8, 8>}, {pipeline_mode = #tpu.pipeline_mode<synchronous>, transform_indices = @transform_1, window_bounds = array<i64: 8, 64>}, {pipeline_mode = #tpu.pipeline_mode<synchronous>, transform_indices = @transform_2, window_bounds = array<i64: 5, 64, 64>}, {pipeline_mode = #tpu.pipeline_mode<synchronous>, transform_indices = @transform_3, window_bounds = array<i64: 6, 1, 64>}, {pipeline_mode = #tpu.pipeline_mode<synchronous>, transform_indices = @transform_4, window_bounds = array<i64: 64, 8>}, {pipeline_mode = #tpu.pipeline_mode<synchronous>, transform_indices = @transform_5, window_bounds = array<i64: 1, 8>}, {transform_indices = @transform_6, window_bounds = array<i64: 8, 8>}]} {
    %c0 = arith.constant 0 : index
    %c0_0 = arith.constant 0 : index
    %0 = vector.load %arg1[%c0, %c0_0] : memref<8x8xf32, #tpu.memory_space<vmem>>, vector<8x8xf32>
    %c0_1 = arith.constant 0 : index
    %c0_2 = arith.constant 0 : index
    %1 = vector.load %arg2[%c0_1, %c0_2] : memref<8x64xf32, #tpu.memory_space<vmem>>, vector<8x64xf32>
    %cst = arith.constant dense<0.000000e+00> : vector<8x64xf32>
    %2 = tpu.matmul %0, %1, %cst {dimension_numbers = #tpu.dot_dimension_numbers<[1], [0], [0], [1], [0, 0, 1, 1], [], []>} : vector<8x8xf32>, vector<8x64xf32>, vector<8x64xf32> -> vector<8x64xf32>
    %c0_3 = arith.constant 0 : index
    %c0_4 = arith.constant 0 : index
    %c0_5 = arith.constant 0 : index
    %3 = vector.load %arg4[%c0_3, %c0_4, %c0_5] : memref<6x1x64xf32, #tpu.memory_space<vmem>>, vector<1x1x64xf32>
    %4 = vector.shape_cast %3 : vector<1x1x64xf32> to vector<1x64xf32>
    %5 = vector.broadcast %4 : vector<1x64xf32> to vector<8x64xf32>
    %6 = arith.addf %2, %5 : vector<8x64xf32>
    %cst_6 = arith.constant 0.000000e+00 : f32
    %7 = vector.broadcast %cst_6 : f32 to vector<8x64xf32>
    %8 = arith.maximumf %6, %7 : vector<8x64xf32>
    %c0_7 = arith.constant 0 : index
    %c0_8 = arith.constant 0 : index
    %c0_9 = arith.constant 0 : index
    %9 = vector.load %arg3[%c0_7, %c0_8, %c0_9] : memref<5x64x64xf32, #tpu.memory_space<vmem>>, vector<1x64x64xf32>
    %10 = vector.shape_cast %9 : vector<1x64x64xf32> to vector<64x64xf32>
    %cst_10 = arith.constant dense<0.000000e+00> : vector<8x64xf32>
    %11 = tpu.matmul %8, %10, %cst_10 {dimension_numbers = #tpu.dot_dimension_numbers<[1], [0], [0], [1], [0, 0, 1, 1], [], []>} : vector<8x64xf32>, vector<64x64xf32>, vector<8x64xf32> -> vector<8x64xf32>
    %c1 = arith.constant 1 : index
    %c0_11 = arith.constant 0 : index
    %c0_12 = arith.constant 0 : index
    %12 = vector.load %arg4[%c1, %c0_11, %c0_12] : memref<6x1x64xf32, #tpu.memory_space<vmem>>, vector<1x1x64xf32>
    %13 = vector.shape_cast %12 : vector<1x1x64xf32> to vector<1x64xf32>
    %14 = vector.broadcast %13 : vector<1x64xf32> to vector<8x64xf32>
    %15 = arith.addf %11, %14 : vector<8x64xf32>
    %cst_13 = arith.constant 0.000000e+00 : f32
    %16 = vector.broadcast %cst_13 : f32 to vector<8x64xf32>
    %17 = arith.maximumf %15, %16 : vector<8x64xf32>
    %c1_14 = arith.constant 1 : index
    %c0_15 = arith.constant 0 : index
    %c0_16 = arith.constant 0 : index
    %18 = vector.load %arg3[%c1_14, %c0_15, %c0_16] : memref<5x64x64xf32, #tpu.memory_space<vmem>>, vector<1x64x64xf32>
    %19 = vector.shape_cast %18 : vector<1x64x64xf32> to vector<64x64xf32>
    %cst_17 = arith.constant dense<0.000000e+00> : vector<8x64xf32>
    %20 = tpu.matmul %17, %19, %cst_17 {dimension_numbers = #tpu.dot_dimension_numbers<[1], [0], [0], [1], [0, 0, 1, 1], [], []>} : vector<8x64xf32>, vector<64x64xf32>, vector<8x64xf32> -> vector<8x64xf32>
    %c2 = arith.constant 2 : index
    %c0_18 = arith.constant 0 : index
    %c0_19 = arith.constant 0 : index
    %21 = vector.load %arg4[%c2, %c0_18, %c0_19] : memref<6x1x64xf32, #tpu.memory_space<vmem>>, vector<1x1x64xf32>
    %22 = vector.shape_cast %21 : vector<1x1x64xf32> to vector<1x64xf32>
    %23 = vector.broadcast %22 : vector<1x64xf32> to vector<8x64xf32>
    %24 = arith.addf %20, %23 : vector<8x64xf32>
    %cst_20 = arith.constant 0.000000e+00 : f32
    %25 = vector.broadcast %cst_20 : f32 to vector<8x64xf32>
    %26 = arith.maximumf %24, %25 : vector<8x64xf32>
    %c2_21 = arith.constant 2 : index
    %c0_22 = arith.constant 0 : index
    %c0_23 = arith.constant 0 : index
    %27 = vector.load %arg3[%c2_21, %c0_22, %c0_23] : memref<5x64x64xf32, #tpu.memory_space<vmem>>, vector<1x64x64xf32>
    %28 = vector.shape_cast %27 : vector<1x64x64xf32> to vector<64x64xf32>
    %cst_24 = arith.constant dense<0.000000e+00> : vector<8x64xf32>
    %29 = tpu.matmul %26, %28, %cst_24 {dimension_numbers = #tpu.dot_dimension_numbers<[1], [0], [0], [1], [0, 0, 1, 1], [], []>} : vector<8x64xf32>, vector<64x64xf32>, vector<8x64xf32> -> vector<8x64xf32>
    %c3 = arith.constant 3 : index
    %c0_25 = arith.constant 0 : index
    %c0_26 = arith.constant 0 : index
    %30 = vector.load %arg4[%c3, %c0_25, %c0_26] : memref<6x1x64xf32, #tpu.memory_space<vmem>>, vector<1x1x64xf32>
    %31 = vector.shape_cast %30 : vector<1x1x64xf32> to vector<1x64xf32>
    %32 = vector.broadcast %31 : vector<1x64xf32> to vector<8x64xf32>
    %33 = arith.addf %29, %32 : vector<8x64xf32>
    %cst_27 = arith.constant 0.000000e+00 : f32
    %34 = vector.broadcast %cst_27 : f32 to vector<8x64xf32>
    %35 = arith.maximumf %33, %34 : vector<8x64xf32>
    %c3_28 = arith.constant 3 : index
    %c0_29 = arith.constant 0 : index
    %c0_30 = arith.constant 0 : index
    %36 = vector.load %arg3[%c3_28, %c0_29, %c0_30] : memref<5x64x64xf32, #tpu.memory_space<vmem>>, vector<1x64x64xf32>
    %37 = vector.shape_cast %36 : vector<1x64x64xf32> to vector<64x64xf32>
    %cst_31 = arith.constant dense<0.000000e+00> : vector<8x64xf32>
    %38 = tpu.matmul %35, %37, %cst_31 {dimension_numbers = #tpu.dot_dimension_numbers<[1], [0], [0], [1], [0, 0, 1, 1], [], []>} : vector<8x64xf32>, vector<64x64xf32>, vector<8x64xf32> -> vector<8x64xf32>
    %c4 = arith.constant 4 : index
    %c0_32 = arith.constant 0 : index
    %c0_33 = arith.constant 0 : index
    %39 = vector.load %arg4[%c4, %c0_32, %c0_33] : memref<6x1x64xf32, #tpu.memory_space<vmem>>, vector<1x1x64xf32>
    %40 = vector.shape_cast %39 : vector<1x1x64xf32> to vector<1x64xf32>
    %41 = vector.broadcast %40 : vector<1x64xf32> to vector<8x64xf32>
    %42 = arith.addf %38, %41 : vector<8x64xf32>
    %cst_34 = arith.constant 0.000000e+00 : f32
    %43 = vector.broadcast %cst_34 : f32 to vector<8x64xf32>
    %44 = arith.maximumf %42, %43 : vector<8x64xf32>
    %c4_35 = arith.constant 4 : index
    %c0_36 = arith.constant 0 : index
    %c0_37 = arith.constant 0 : index
    %45 = vector.load %arg3[%c4_35, %c0_36, %c0_37] : memref<5x64x64xf32, #tpu.memory_space<vmem>>, vector<1x64x64xf32>
    %46 = vector.shape_cast %45 : vector<1x64x64xf32> to vector<64x64xf32>
    %cst_38 = arith.constant dense<0.000000e+00> : vector<8x64xf32>
    %47 = tpu.matmul %44, %46, %cst_38 {dimension_numbers = #tpu.dot_dimension_numbers<[1], [0], [0], [1], [0, 0, 1, 1], [], []>} : vector<8x64xf32>, vector<64x64xf32>, vector<8x64xf32> -> vector<8x64xf32>
    %c5 = arith.constant 5 : index
    %c0_39 = arith.constant 0 : index
    %c0_40 = arith.constant 0 : index
    %48 = vector.load %arg4[%c5, %c0_39, %c0_40] : memref<6x1x64xf32, #tpu.memory_space<vmem>>, vector<1x1x64xf32>
    %49 = vector.shape_cast %48 : vector<1x1x64xf32> to vector<1x64xf32>
    %50 = vector.broadcast %49 : vector<1x64xf32> to vector<8x64xf32>
    %51 = arith.addf %47, %50 : vector<8x64xf32>
    %cst_41 = arith.constant 0.000000e+00 : f32
    %52 = vector.broadcast %cst_41 : f32 to vector<8x64xf32>
    %53 = arith.maximumf %51, %52 : vector<8x64xf32>
    %c0_42 = arith.constant 0 : index
    %c0_43 = arith.constant 0 : index
    %54 = vector.load %arg5[%c0_42, %c0_43] : memref<64x8xf32, #tpu.memory_space<vmem>>, vector<64x8xf32>
    %cst_44 = arith.constant dense<0.000000e+00> : vector<8x8xf32>
    %55 = tpu.matmul %53, %54, %cst_44 {dimension_numbers = #tpu.dot_dimension_numbers<[1], [0], [0], [1], [0, 0, 1, 1], [], []>} : vector<8x64xf32>, vector<64x8xf32>, vector<8x8xf32> -> vector<8x8xf32>
    %c0_45 = arith.constant 0 : index
    %c0_46 = arith.constant 0 : index
    %56 = vector.load %arg6[%c0_45, %c0_46] : memref<1x8xf32, #tpu.memory_space<vmem>>, vector<1x8xf32>
    %57 = vector.broadcast %56 : vector<1x8xf32> to vector<8x8xf32>
    %58 = arith.addf %55, %57 : vector<8x8xf32>
    %c0_47 = arith.constant 0 : index
    %c0_48 = arith.constant 0 : index
    %59 = vector.load %arg7[%c0_47, %c0_48] : memref<8x8xf32, #tpu.memory_space<vmem>>, vector<8x8xf32>
    tpu.vector_store %arg7[%c0_47, %c0_48], %58 {strides = array<i32>} : memref<8x8xf32, #tpu.memory_space<vmem>>, vector<8x8xf32>,
    return
  }
  func.func @transform_0(%arg0: i32) -> (i32, i32) {
    %c0_i32 = arith.constant 0 : i32
    %c0_i32_0 = arith.constant 0 : i32
    return %arg0, %c0_i32 : i32, i32
  }
  func.func @transform_1(%arg0: i32) -> (i32, i32) {
    %c0_i32 = arith.constant 0 : i32
    %c0_i32_0 = arith.constant 0 : i32
    %c0_i32_1 = arith.constant 0 : i32
    return %c0_i32, %c0_i32_0 : i32, i32
  }
  func.func @transform_2(%arg0: i32) -> (i32, i32, i32) {
    %c0_i32 = arith.constant 0 : i32
    %c0_i32_0 = arith.constant 0 : i32
    %c0_i32_1 = arith.constant 0 : i32
    %c0_i32_2 = arith.constant 0 : i32
    return %c0_i32, %c0_i32_0, %c0_i32_1 : i32, i32, i32
  }
  func.func @transform_3(%arg0: i32) -> (i32, i32, i32) {
    %c0_i32 = arith.constant 0 : i32
    %c0_i32_0 = arith.constant 0 : i32
    %c0_i32_1 = arith.constant 0 : i32
    %c0_i32_2 = arith.constant 0 : i32
    return %c0_i32, %c0_i32_0, %c0_i32_1 : i32, i32, i32
  }
  func.func @transform_4(%arg0: i32) -> (i32, i32) {
    %c0_i32 = arith.constant 0 : i32
    %c0_i32_0 = arith.constant 0 : i32
    %c0_i32_1 = arith.constant 0 : i32
    return %c0_i32, %c0_i32_0 : i32, i32
  }
  func.func @transform_5(%arg0: i32) -> (i32, i32) {
    %c0_i32 = arith.constant 0 : i32
    %c0_i32_0 = arith.constant 0 : i32
    %c0_i32_1 = arith.constant 0 : i32
    return %c0_i32, %c0_i32_0 : i32, i32
  }
  func.func @transform_6(%arg0: i32) -> (i32, i32) {
    %c0_i32 = arith.constant 0 : i32
    %c0_i32_0 = arith.constant 0 : i32
    return %arg0, %c0_i32 : i32, i32
  }
}

</mosaic_0001>

<bundles_post_ra>
// kernel: policy_forward.1
= control target key start
LH: loop header
LB: loop body
LE: loop exit
PB: predicated region body
PF: predicated region fallthrough
CT: control target
= control target key end

     0   :  { %11 = vsyncpa [#allocation3], 0  ;;  %s966_s21 = smov [#allocation2]   ;;  %s1120_s0 = inlined_call_operand.vmem [shape: f32[8,8], index: 0, kind: input, shape index: {}]   ;;  %s1121_s1 = inlined_call_operand.vmem [shape: f32[8,64], index: 1, kind: input, shape index: {}]   ;;  %s1122_s2 = inlined_call_operand.hbm [shape: f32[5,64,64], index: 2, kind: input, shape index: {}]   ;;  %s1123_s3 = inlined_call_operand.vmem [shape: f32[6,1,64], index: 3, kind: input, shape index: {}]   ;;  %s1124_s4 = inlined_call_operand.vmem [shape: f32[64,8], index: 4, kind: input, shape index: {}]   ;;  %s1125_s5 = inlined_call_operand.vmem [shape: f32[1,8], index: 5, kind: input, shape index: {}]   ;;  %s1126_s6 = inlined_call_operand.vmem [shape: f32[8,8], index: 6, kind: output, shape index: {}]  }
   0x1   :  { %s21_s22 = sshll.u32 %s966_s21, 4  ;;  %s942_s25 = scalar_lea.hbm %s1122_s2, 5120  ;;  %s22_s22 = int_to_ptr.vmem [resolvable:$true] %s21_s22 }
   0x2   :  { %p943_p0 = scmp.ne.s32.totalorder %s1122_s2, %s942_s25  ;;  %p946_p1 = scmp.lt.u32.totalorder %s942_s25, %s1122_s2 }
   0x4   :  { %p948_p2 = pnand %p946_p1, %p943_p0 }
   0x6   :  { %951 = shalt.err (!%p948_p2)
}
   0x7   :  { %s952_s30 = scalar_lea.vmem %s22_s22, 5120  ;;  %p957_p4 = scmp.lt.s32.totalorder %s22_s22, %s22_s22 }
   0x8   :  { %p953_p3 = scmp.ne.s32.totalorder %s22_s22, %s952_s30  ;;  %p958_p5 = scmp.lt.s32.totalorder %s952_s30, %s952_s30 }
   0xa   :  { %p959_p6 = por %p958_p5, %p957_p4 }
   0xc   :  { %p960_p7 = pnand %p959_p6, %p953_p3 }
   0xe   :  { %963 = shalt.err (!%p960_p7)
}
   0xf   :  { %s967_s7 = smov 128   ;;  %s968_s8 = smov 8  }
  0x10   :  { %27 = dma.hbm_to_vmem [thread:$0]  %s1122_s2, 5120, %s22_s22, [#allocation3], %s967_s7, %s967_s7, %s968_s8  }
  0x11   :  { %964 = dma.done.wait [#allocation3], 5120  }
  0x12   :  { %965 = vsyncadd [#allocation3], 4294962176  ;;  %v969_v0 = vmov 0.0   ;;  %vm970_vm0 = vmmov 0   ;;  %v971_v1 = vmov 0.0|0.0   ;;  %vm46_vm1 = vcmask 64512  }
  0x13   :  { %745 = vmatprep.subr.mxu0 %v969_v0  ;;  %747 = vmatprep.mubr.msk.f32.mxu0 %vm970_vm0, %v969_v0  ;;  %v38_v2 = vld [vmem:[%s1121_s1] sm:$0xff]  ;;  %v122_v5 = vld [vmem:[#allocation2 + $0x8] sm:$0xff]  ;;  %v123_v6 = vld [vmem:[#allocation2 + $0x10] sm:$0xff]  ;;  %vm137_vm2 = vcmask 523264  }
  0x14   :  { %864 = vmatprep.subr.bf16.mxu1 %v971_v1  ;;  %766 = vmatprep.mubr.msk.f32.mxu1 %vm970_vm0, %v969_v0  ;;  %v37_v3 = vld [vmem:[%s1120_s0] sm:$0xff]  ;;  %v124_v7 = vld [vmem:[#allocation2 + $0x18] sm:$0xff]  ;;  %v126_v11 = vld [vmem:[#allocation2 + $0x28] sm:$0xff] }
  0x15   :  { %v121_v4 = vld [vmem:[#allocation2] sm:$0xff]  ;;  %746 = vmatpush3.msra.mxu0 %v38_v2  ;;  %v868_v9 = vpack.c.bf16 %v124_v7, %v123_v6  ;;  %v127_v13 = vld [vmem:[#allocation2 + $0x30] sm:$0xff]  ;;  %v128_v14 = vld [vmem:[#allocation2 + $0x38] sm:$0xff] }
  0x16   :  { %748 = vmatmul.mubr.msk.f32.vlgmr.msra.gmra.mrb[0].mxu0 %vm46_vm1, %v37_v3  ;;  %v865_v8 = vpack.c.bf16 %v122_v5, %v121_v4  ;;  %876 = vmatprep.subr.bf16.mxu0 %v971_v1  ;;  %v125_v10 = vld [vmem:[#allocation2 + $0x20] sm:$0xff]  ;;  %v874_v15 = vpack.c.bf16 %v128_v14, %v127_v13  ;;  %v214_v17 = vld [vmem:[#allocation2 + $0x48] sm:$0xff]  ;;  %v215_v18 = vld [vmem:[#allocation2 + $0x50] sm:$0xff] }
  0x17   :  { %785 = vmatprep.mubr.msk.f32.mxu0 %vm970_vm0, %v969_v0  ;;  %v871_v12 = vpack.c.bf16 %v126_v11, %v125_v10  ;;  %v213_v16 = vld [vmem:[#allocation2 + $0x40] sm:$0xff]  ;;  %v216_v20 = vld [vmem:[#allocation2 + $0x58] sm:$0xff]  ;;  %v218_v23 = vld [vmem:[#allocation2 + $0x68] sm:$0xff] }
  0x18   :  { %866 = vmatpush3.bf16.msra.mxu1 %v865_v8  ;;  %v877_v19 = vpack.c.bf16 %v214_v17, %v213_v16  ;;  %v880_v21 = vpack.c.bf16 %v216_v20, %v215_v18  ;;  %v217_v22 = vld [vmem:[#allocation2 + $0x60] sm:$0xff]  ;;  %v219_v30 = vld [vmem:[#allocation2 + $0x70] sm:$0xff]  ;;  %v220_v31 = vld [vmem:[#allocation2 + $0x78] sm:$0xff] }
  0x19   :  { %867 = vmatprep.subr.bf16.mxu1 %v971_v1  ;;  %v883_v24 = vpack.c.bf16 %v218_v23, %v217_v22  ;;  %v670_v25 = vld [vmem:[%s1123_s3] ss:$0 sm:$0xff]  ;;  %v886_v32 = vpack.c.bf16 %v220_v31, %v219_v30  ;;  %v305_v34 = vld [vmem:[#allocation2 + $0x88] sm:$0xff]  ;;  %v306_v35 = vld [vmem:[#allocation2 + $0x90] sm:$0xff] }
  0x1a   :  { %878 = vmatpush3.bf16.msra.mxu0 %v877_v19  ;;  %v304_v33 = vld [vmem:[#allocation2 + $0x80] sm:$0xff]  ;;  %v307_v37 = vld [vmem:[#allocation2 + $0x98] sm:$0xff]  ;;  %v309_v40 = vld [vmem:[#allocation2 + $0xa8] sm:$0xff] }
  0x1b   :  { %879 = vmatprep.subr.bf16.mxu0 %v971_v1  ;;  %v889_v36 = vpack.c.bf16 %v305_v34, %v304_v33  ;;  %v892_v38 = vpack.c.bf16 %v307_v37, %v306_v35  ;;  %v308_v39 = vld [vmem:[#allocation2 + $0xa0] sm:$0xff]  ;;  %v310_v47 = vld [vmem:[#allocation2 + $0xb0] sm:$0xff]  ;;  %v311_v48 = vld [vmem:[#allocation2 + $0xb8] sm:$0xff] }
  0x1c   :  { %869 = vmatpush3.bf16.msra.mxu1 %v868_v9  ;;  %v895_v41 = vpack.c.bf16 %v309_v40, %v308_v39  ;;  %v673_v42 = vld [vmem:[%s1123_s3 + $0x1] ss:$0 sm:$0xff]  ;;  %v898_v49 = vpack.c.bf16 %v311_v48, %v310_v47  ;;  %v396_v51 = vld [vmem:[#allocation2 + $0xc8] sm:$0xff]  ;;  %v397_v52 = vld [vmem:[#allocation2 + $0xd0] sm:$0xff] }
  0x1d   :  { %870 = vmatprep.subr.bf16.mxu1 %v971_v1  ;;  %v395_v50 = vld [vmem:[#allocation2 + $0xc0] sm:$0xff]  ;;  %v398_v54 = vld [vmem:[#allocation2 + $0xd8] sm:$0xff]  ;;  %v400_v57 = vld [vmem:[#allocation2 + $0xe8] sm:$0xff] }
  0x1e   :  { %881 = vmatpush3.bf16.msra.mxu0 %v880_v21  ;;  %v901_v53 = vpack.c.bf16 %v396_v51, %v395_v50  ;;  %v904_v55 = vpack.c.bf16 %v398_v54, %v397_v52  ;;  %v399_v56 = vld [vmem:[#allocation2 + $0xe0] sm:$0xff]  ;;  %v401_v2 = vld [vmem:[#allocation2 + $0xf0] sm:$0xff]  ;;  %v402_v3 = vld [vmem:[#allocation2 + $0xf8] sm:$0xff] }
  0x1f   :  { %882 = vmatprep.subr.bf16.mxu0 %v971_v1  ;;  %v907_v58 = vpack.c.bf16 %v400_v57, %v399_v56  ;;  %v676_v59 = vld [vmem:[%s1123_s3 + $0x2] ss:$0 sm:$0xff]  ;;  %v910_v4 = vpack.c.bf16 %v402_v3, %v401_v2  ;;  %v487_v6 = vld [vmem:[#allocation2 + $0x108] sm:$0xff]  ;;  %v488_v7 = vld [vmem:[#allocation2 + $0x110] sm:$0xff] }
  0x20   :  { %872 = vmatpush3.bf16.msra.mxu1 %v871_v12  ;;  %v486_v5 = vld [vmem:[#allocation2 + $0x100] sm:$0xff]  ;;  %v489_v9 = vld [vmem:[#allocation2 + $0x118] sm:$0xff]  ;;  %v491_v12 = vld [vmem:[#allocation2 + $0x128] sm:$0xff] }
  0x21   :  { %873 = vmatprep.subr.bf16.mxu1 %v971_v1  ;;  %v913_v8 = vpack.c.bf16 %v487_v6, %v486_v5  ;;  %v916_v10 = vpack.c.bf16 %v489_v9, %v488_v7  ;;  %v490_v11 = vld [vmem:[#allocation2 + $0x120] sm:$0xff]  ;;  %v492_v19 = vld [vmem:[#allocation2 + $0x130] sm:$0xff]  ;;  %v493_v20 = vld [vmem:[#allocation2 + $0x138] sm:$0xff] }
  0x22   :  { %884 = vmatpush3.bf16.msra.mxu0 %v883_v24  ;;  %v919_v13 = vpack.c.bf16 %v491_v12, %v490_v11  ;;  %v679_v14 = vld [vmem:[%s1123_s3 + $0x3] ss:$0 sm:$0xff]  ;;  %v922_v21 = vpack.c.bf16 %v493_v20, %v492_v19  ;;  %v577_v23 = vld [vmem:[%s1124_s4 + $0x8] sm:$0xff]  ;;  %v578_v24 = vld [vmem:[%s1124_s4 + $0x10] sm:$0xff] }
  0x23   :  { %885 = vmatprep.subr.bf16.mxu0 %v971_v1  ;;  %v576_v22 = vld [vmem:[%s1124_s4] sm:$0xff]  ;;  %v582_v35 = vld [vmem:[%s1124_s4 + $0x30] sm:$0xff] }
  0x24   :  { %875 = vmatpush3.bf16.msra.mxu1 %v874_v15  ;;  %v682_v30 = vld [vmem:[%s1123_s3 + $0x4] ss:$0 sm:$0xff] }
  0x25   :  { %888 = vmatprep.subr.bf16.mxu1 %v971_v1 }
  0x26   :  { %887 = vmatpush3.bf16.msra.mxu0 %v886_v32 }
  0x27   :  { %900 = vmatprep.subr.bf16.mxu0 %v971_v1 }
  0xe9   :  { %v116_v26 = vpop.f32.mrb[0].mxu0 }
  0xea   :  { %v117_v27 = vadd.f32 %v670_v25, %v116_v26  ;;  %v749_v28 = vpop.f32.mrb[1].mxu0  ;;  %v925_v25 = vpack.c.bf16 %v577_v23, %v576_v22 }
  0xeb   :  { %v581_v28 = vld [vmem:[%s1124_s4 + $0x28] sm:$0xff] }
  0xec   :  { %v120_v29 = vmax.f32 %v117_v27, 0.0  ;;  %v580_v27 = vld [vmem:[%s1124_s4 + $0x20] sm:$0xff] }
  0xee   :  { %767 = vmatmul.mubr.msk.f32.vlgmr.msra.gmra.mrb[0].mxu1 %vm137_vm2, %v120_v29  ;;  %v931_v29 = vpack.c.bf16 %v581_v28, %v580_v27 }
  0xef   :  { %804 = vmatprep.mubr.msk.f32.mxu1 %vm970_vm0, %v969_v0  ;;  %890 = vmatpush3.bf16.msra.mxu1 %v889_v36  ;;  %v583_v36 = vld [vmem:[%s1124_s4 + $0x38] sm:$0xff] }
  0xf0   :  { %891 = vmatprep.subr.bf16.mxu1 %v971_v1  ;;  %v934_v37 = vpack.c.bf16 %v583_v36, %v582_v35 }
  0xf3   :  { %893 = vmatpush3.bf16.msra.mxu1 %v892_v38 }
  0xf4   :  { %894 = vmatprep.subr.bf16.mxu1 %v971_v1 }
  0xf7   :  { %896 = vmatpush3.bf16.msra.mxu1 %v895_v41 }
  0xf8   :  { %897 = vmatprep.subr.bf16.mxu1 %v971_v1 }
  0xfb   :  { %899 = vmatpush3.bf16.msra.mxu1 %v898_v49 }
  0xfc   :  { %912 = vmatprep.subr.bf16.mxu1 %v971_v1 }
 0x1c1   :  { %v207_v43 = vpop.f32.mrb[0].mxu1 }
 0x1c2   :  { %v208_v44 = vadd.f32 %v673_v42, %v207_v43  ;;  %v768_v45 = vpop.f32.mrb[1].mxu1  ;;  %v687_v42 = vld [vmem:[%s1125_s5] ss:$0 sm:$0xff] }
 0x1c4   :  { %v211_v46 = vmax.f32 %v208_v44, 0.0 }
 0x1c6   :  { %786 = vmatmul.mubr.msk.f32.vlgmr.msra.gmra.mrb[2].mxu0 %vm137_vm2, %v211_v46 }
 0x1c7   :  { %823 = vmatprep.mubr.msk.f32.mxu0 %vm970_vm0, %v969_v0  ;;  %902 = vmatpush3.bf16.msra.mxu0 %v901_v53 }
 0x1c8   :  { %903 = vmatprep.subr.bf16.mxu0 %v971_v1 }
 0x1cb   :  { %905 = vmatpush3.bf16.msra.mxu0 %v904_v55 }
 0x1cc   :  { %906 = vmatprep.subr.bf16.mxu0 %v971_v1 }
 0x1cf   :  { %908 = vmatpush3.bf16.msra.mxu0 %v907_v58 }
 0x1d0   :  { %909 = vmatprep.subr.bf16.mxu0 %v971_v1 }
 0x1d3   :  { %911 = vmatpush3.bf16.msra.mxu0 %v910_v4 }
 0x1d4   :  { %924 = vmatprep.subr.bf16.mxu0 %v971_v1 }
 0x299   :  { %v298_v60 = vpop.f32.mrb[2].mxu0 }
 0x29a   :  { %v299_v61 = vadd.f32 %v676_v59, %v298_v60  ;;  %v787_v62 = vpop.f32.mrb[3].mxu0 }
 0x29c   :  { %v302_v63 = vmax.f32 %v299_v61, 0.0 }
 0x29e   :  { %805 = vmatmul.mubr.msk.f32.vlgmr.msra.gmra.mrb[2].mxu1 %vm137_vm2, %v302_v63 }
 0x29f   :  { %842 = vmatprep.mubr.msk.f32.mxu1 %vm970_vm0, %v969_v0  ;;  %914 = vmatpush3.bf16.msra.mxu1 %v913_v8 }
 0x2a0   :  { %915 = vmatprep.subr.bf16.mxu1 %v971_v1 }
 0x2a3   :  { %917 = vmatpush3.bf16.msra.mxu1 %v916_v10 }
 0x2a4   :  { %918 = vmatprep.subr.bf16.mxu1 %v971_v1 }
 0x2a7   :  { %920 = vmatpush3.bf16.msra.mxu1 %v919_v13 }
 0x2a8   :  { %921 = vmatprep.subr.bf16.mxu1 %v971_v1 }
 0x2ab   :  { %923 = vmatpush3.bf16.msra.mxu1 %v922_v21 }
 0x371   :  { %v389_v15 = vpop.f32.mrb[2].mxu1 }
 0x372   :  { %v390_v16 = vadd.f32 %v679_v14, %v389_v15  ;;  %v806_v17 = vpop.f32.mrb[3].mxu1 }
 0x374   :  { %v393_v18 = vmax.f32 %v390_v16, 0.0 }
 0x376   :  { %824 = vmatmul.mubr.msk.f32.vlgmr.msra.gmra.mrb[4].mxu0 %vm137_vm2, %v393_v18 }
 0x377   :  { %861 = vmatprep.mubr.msk.f32.mxu0 %vm970_vm0, %v969_v0  ;;  %v579_v0 = vld [vmem:[%s1124_s4 + $0x18] sm:$0xff]  ;;  %926 = vmatpush3.bf16.msra.mxu0 %v925_v25 }
 0x378   :  { %v928_v26 = vpack.c.bf16 %v579_v0, %v578_v24  ;;  %927 = vmatprep.subr.bf16.mxu0 %v971_v1 }
 0x37b   :  { %929 = vmatpush3.bf16.msra.mxu0 %v928_v26 }
 0x37c   :  { %930 = vmatprep.subr.bf16.mxu0 %v971_v1 }
 0x37f   :  { %932 = vmatpush3.bf16.msra.mxu0 %v931_v29 }
 0x380   :  { %933 = vmatprep.subr.bf16.mxu0 %v971_v1  ;;  %v685_v1 = vld [vmem:[%s1123_s3 + $0x5] ss:$0 sm:$0xff] }
 0x383   :  { %935 = vmatpush3.bf16.msra.mxu0 %v934_v37 }
 0x449   :  { %v480_v31 = vpop.f32.mrb[4].mxu0 }
 0x44a   :  { %v481_v32 = vadd.f32 %v682_v30, %v480_v31  ;;  %v825_v33 = vpop.f32.mrb[5].mxu0 }
 0x44c   :  { %v484_v34 = vmax.f32 %v481_v32, 0.0 }
 0x44e   :  { %843 = vmatmul.mubr.msk.f32.vlgmr.msra.gmra.mrb[4].mxu1 %vm137_vm2, %v484_v34 }
 0x521   :  { %v571_v38 = vpop.f32.mrb[4].mxu1 }
 0x522   :  { %v572_v39 = vadd.f32 %v685_v1, %v571_v38  ;;  %v844_v40 = vpop.f32.mrb[5].mxu1 }
 0x524   :  { %v575_v41 = vmax.f32 %v572_v39, 0.0 }
 0x526   :  { %862 = vmatmul.mubr.msk.f32.vlgmr.msra.gmra.mrb[6].mxu0 %vm137_vm2, %v575_v41 }
 0x5f9   :  { %v660_v43 = vpop.f32.mrb[6].mxu0 }
 0x5fa   :  { %v661_v44 = vadd.f32 %v687_v42, %v660_v43  ;;  %v863_v45 = vpop.f32.mrb[7].mxu0 }
 0x5fc   :  { %664 = vst.msk [vmem:[%s1126_s6] sm:$0xff] %vm46_vm1, %v661_v44 }
 0x5fd   :  { %669 = vsyncpa [#allocation3], 1 }

</bundles_post_ra>
